<compile_context>
chip_gen: v5e
topology: v5e:2x2
jax: 0.10.0
libtpu: 0.0.40
codegen_flags: <defaults>
</compile_context>

<pallas_src>
import functools
from typing import NamedTuple

import jax
import jax.numpy as jnp
from jax.experimental import pallas as pl
from jax.experimental.pallas import tpu as pltpu

LANE = 128        # pad feature dims to the lane width -> lane-dense stores
ROW_ALIGN = 16    # row alignment that is safe for bf16 (16, 128) packed tiles


def _round_up(x, m):
    return (x + m - 1) // m * m


def _device_kind():
    try:
        return jax.devices()[0].device_kind.lower()
    except Exception:  # pragma: no cover - CPU fallback / odd runtimes
        return ""


# --------------------------------------------------------------------------
# Kernels
# --------------------------------------------------------------------------

def graphsage_fused_kernel(adj_ref, x_ref, invdeg_ref,
                           wl1_ref, wr1_ref, b1_ref,
                           wl2_ref, wr2_ref, b2_ref, out_ref):
    """Both SAGEConv layers for a graph that fits entirely in VMEM.

    adj_ref    : (Np, Np) bf16   binary adjacency^T (target, source)
    x_ref      : (Np, Fp) bf16   node features
    invdeg_ref : (Np, 1)  f32    1 / in-degree (0 for isolated targets)
    wl*/wr*    : bf16 padded weights, b* : f32 padded biases
    out_ref    : (Np, Fp) f32
    """
    adj = adj_ref[...]
    x = x_ref[...]
    invdeg = invdeg_ref[...]

    # Layer 1: mean aggregation (binary-A @ x on the MXU, f32 acc), 1/deg on
    # the VPU, then two dots summed in f32 (neighbor + root transform).
    agg1 = (jnp.dot(adj, x, preferred_element_type=jnp.float32)
            * invdeg).astype(jnp.bfloat16)
    h1 = (jnp.dot(agg1, wl1_ref[...], preferred_element_type=jnp.float32)
          + jnp.dot(x, wr1_ref[...], preferred_element_type=jnp.float32)
          + b1_ref[...])
    h1 = jnp.maximum(h1, 0.0).astype(jnp.bfloat16)   # h1 kept on-chip, bf16

    # Layer 2 (no ReLU).
    agg2 = (jnp.dot(adj, h1, preferred_element_type=jnp.float32)
            * invdeg).astype(jnp.bfloat16)
    out_ref[...] = (jnp.dot(agg2, wl2_ref[...], preferred_element_type=jnp.float32)
                    + jnp.dot(h1, wr2_ref[...], preferred_element_type=jnp.float32)
                    + b2_ref[...])


def sage_layer_tiled_kernel(adj_ref, xsrc_ref, xself_ref, invdeg_ref,
                            wl_ref, wr_ref, b_ref, out_ref, acc_ref,
                            *, apply_relu):
    """One SAGEConv layer, row-tile x source(K)-tile grid.

    adj_ref    : (tm, tk)  bf16  adjacency^T tile (targets of this row tile,
                                 sources of this K tile)
    xsrc_ref   : (tk, Fi)  bf16  source-node feature tile (streamed over K)
    xself_ref  : (tm, Fi)  bf16  this row tile's own (root) features
                                 (index map ignores K -> fetched once per row)
    invdeg_ref : (tm, 1)   f32   1 / in-degree
    wl/wr      : (Fi, Fo)  bf16  grid-invariant weights (Buffered(1))
    b_ref      : (1, Fo)   f32   bias of lin_l
    out_ref    : (tm, Fo)        written on the last K step only
    acc_ref    : (tm, Fi)  f32   VMEM accumulator for the aggregation
    """
    k = pl.program_id(1)

    @pl.when(k == 0)
    def _():
        acc_ref[...] = jnp.zeros_like(acc_ref)

    # Partial mean aggregation for this source tile (bf16 MXU, f32 acc).
    acc_ref[...] += jnp.dot(adj_ref[...], xsrc_ref[...],
                            preferred_element_type=jnp.float32)

    @pl.when(k == pl.num_programs(1) - 1)
    def _():
        agg = (acc_ref[...] * invdeg_ref[...]).astype(jnp.bfloat16)
        out = (jnp.dot(agg, wl_ref[...], preferred_element_type=jnp.float32)
               + jnp.dot(xself_ref[...], wr_ref[...],
                         preferred_element_type=jnp.float32)
               + b_ref[...])
        if apply_relu:
            out = jnp.maximum(out, 0.0)
        out_ref[...] = out.astype(out_ref.dtype)


# --------------------------------------------------------------------------
# pallas_call wrappers
# --------------------------------------------------------------------------

def _full_spec(shape):
    return pl.BlockSpec(shape, lambda i: (0,) * len(shape))


def _fused_call(prep, xp):
    Np, Fp, Hp = prep.n_pad, prep.f_pad, prep.h_pad
    return pl.pallas_call(
        graphsage_fused_kernel,
        out_shape=jax.ShapeDtypeStruct((Np, Fp), jnp.float32),
        grid_spec=pltpu.PrefetchScalarGridSpec(
            num_scalar_prefetch=0,
            grid=(1,),
            in_specs=[
                _full_spec((Np, Np)),   # adjacency^T
                _full_spec((Np, Fp)),   # x (bf16)
                _full_spec((Np, 1)),    # 1/deg
                _full_spec((Fp, Hp)),   # W_l1
                _full_spec((Fp, Hp)),   # W_r1
                _full_spec((1, Hp)),    # b1
                _full_spec((Hp, Fp)),   # W_l2
                _full_spec((Hp, Fp)),   # W_r2
                _full_spec((1, Fp)),    # b2
            ],
            out_specs=_full_spec((Np, Fp)),
        ),
        compiler_params=pltpu.CompilerParams(
            vmem_limit_bytes=prep.vmem_limit),
    )(prep.adj_t, xp, prep.inv_deg,
      prep.wl1, prep.wr1, prep.b1, prep.wl2, prep.wr2, prep.b2)


def _tiled_layer(prep, x_bf, wl, wr, b, *, apply_relu, out_dtype):
    """Row x source(K) tiled pallas_call for one SAGEConv layer."""
    Np = prep.n_pad
    tm = prep.tm
    tk = prep.tm                      # square adjacency tiles
    Fi = x_bf.shape[1]                # padded input feature dim
    Fo = wl.shape[1]                  # padded output feature dim
    kernel = functools.partial(sage_layer_tiled_kernel, apply_relu=apply_relu)
    return pl.pallas_call(
        kernel,
        out_shape=jax.ShapeDtypeStruct((Np, Fo), out_dtype),
        grid_spec=pltpu.PrefetchScalarGridSpec(
            num_scalar_prefetch=0,
            grid=(Np // tm, Np // tk),             # (row tiles, source tiles)
            in_specs=[
                pl.BlockSpec((tm, tk), lambda i, k: (i, k)),    # adj^T tile
                pl.BlockSpec((tk, Fi), lambda i, k: (k, 0)),    # source feats
                pl.BlockSpec((tm, Fi), lambda i, k: (i, 0)),    # root feats
                pl.BlockSpec((tm, 1), lambda i, k: (i, 0)),     # 1/deg
                pl.BlockSpec((Fi, Fo), lambda i, k: (0, 0),
                             pipeline_mode=pl.Buffered(1)),      # W_l (invariant)
                pl.BlockSpec((Fi, Fo), lambda i, k: (0, 0),
                             pipeline_mode=pl.Buffered(1)),      # W_r (invariant)
                pl.BlockSpec((1, Fo), lambda i, k: (0, 0),
                             pipeline_mode=pl.Buffered(1)),      # bias (invariant)
            ],
            out_specs=pl.BlockSpec((tm, Fo), lambda i, k: (i, 0)),
            scratch_shapes=[pltpu.VMEM((tm, Fi), jnp.float32)],  # agg accumulator
        ),
        compiler_params=pltpu.CompilerParams(
            dimension_semantics=("parallel", "arbitrary"),
            vmem_limit_bytes=prep.vmem_limit),
    )(prep.adj_t, x_bf, x_bf, prep.inv_deg, wl, wr, b)


# --------------------------------------------------------------------------
# One-time preprocessing + forward
# --------------------------------------------------------------------------

class SAGEPrep(NamedTuple):
    adj_t: jax.Array      # (Np, Np) bf16 binary adjacency^T
    inv_deg: jax.Array    # (Np, 1)  f32
    wl1: jax.Array
    wr1: jax.Array
    b1: jax.Array
    wl2: jax.Array
    wr2: jax.Array
    b2: jax.Array
    n: int
    f: int
    h: int
    n_pad: int
    f_pad: int
    h_pad: int
    tm: int
    fused: bool
    vmem_limit: int


def prepare_graphsage(adj, params, *, row_tile=None, vmem_limit_bytes=None):
    """One-time per-graph/per-model preprocessing (hoisted out of forward)."""
    wl1, wr1, b1, wl2, wr2, b2 = params
    N = adj.shape[0]
    F = wl1.shape[0]
    H = wl1.shape[1]

    kind = _device_kind()
    if row_tile is None:
        # v5e MXU is 4x128^2 -> 128; v6e/v7x are 2x256^2 -> 256.
        row_tile = 128 if "v5" in kind else 256
    row_tile = _round_up(row_tile, ROW_ALIGN)
    if vmem_limit_bytes is None:
        # 128 MiB physical on v5e/v6e; 64 MiB on v7x -> stay conservative there.
        vmem_limit_bytes = (96 if ("v5" in kind or "v6" in kind) else 48) * 1024 * 1024

    Fp = _round_up(F, LANE)
    Hp = _round_up(H, LANE)

    n_min = _round_up(N, ROW_ALIGN)
    fused = n_min <= row_tile          # whole graph fits a single row tile
    if fused:
        tm = n_min
        Np = n_min
    else:
        tm = row_tile
        Np = _round_up(N, tm)          # guarantees >= 2 row tiles (megacore)

    # Raw binary adjacency^T (target, source) + reciprocal in-degree.
    mask_t = (adj != 0).astype(jnp.float32).T
    deg = jnp.sum(mask_t, axis=1, keepdims=True)
    inv_deg = jnp.where(deg > 0, 1.0 / jnp.maximum(deg, 1.0), 0.0)

    adj_t = jnp.zeros((Np, Np), jnp.bfloat16).at[:N, :N].set(
        mask_t.astype(jnp.bfloat16))
    invd = jnp.zeros((Np, 1), jnp.float32).at[:N, :].set(inv_deg)

    def pad_w(w, fin, fout, fin_p, fout_p):
        return (jnp.zeros((fin_p, fout_p), jnp.float32)
                .at[:fin, :fout].set(w).astype(jnp.bfloat16))

    def pad_b(b, fout, fout_p):
        return jnp.zeros((1, fout_p), jnp.float32).at[:, :fout].set(
            jnp.asarray(b, jnp.float32).reshape(1, -1))

    return SAGEPrep(
        adj_t=adj_t, inv_deg=invd,
        wl1=pad_w(wl1, F, H, Fp, Hp), wr1=pad_w(wr1, F, H, Fp, Hp),
        b1=pad_b(b1, H, Hp),
        wl2=pad_w(wl2, H, F, Hp, Fp), wr2=pad_w(wr2, H, F, Hp, Fp),
        b2=pad_b(b2, F, Fp),
        n=N, f=F, h=H, n_pad=Np, f_pad=Fp, h_pad=Hp,
        tm=tm, fused=fused, vmem_limit=vmem_limit_bytes)


def graphsage_forward(prep, x):
    """Full 2-layer GraphSAGE forward on preprocessed graph/weights."""
    N, F = prep.n, prep.f
    # Per-forward glue: pad + bf16-cast the node features once (the kernels
    # consume bf16 directly; no in-kernel f32->bf16 cast of the big block).
    xp = jnp.zeros((prep.n_pad, prep.f_pad), jnp.bfloat16).at[:N, :F].set(
        x.astype(jnp.bfloat16))

    if prep.fused:
        out = _fused_call(prep, xp)
    else:
        h1 = _tiled_layer(prep, xp, prep.wl1, prep.wr1, prep.b1,
                          apply_relu=True, out_dtype=jnp.bfloat16)
        out = _tiled_layer(prep, h1, prep.wl2, prep.wr2, prep.b2,
                           apply_relu=False, out_dtype=jnp.float32)
    # TODO(synk): for sparse graphs (<~10% density) replace the dense N^2
    # adjacency stream with a scalar-prefetch gather SpMM (edge-proportional
    # HBM traffic); unnecessary at these sizes.
    return out[:N, :F]


# --------------------------------------------------------------------------
# Pure-JAX reference (mirrors the kernel numerics: bf16 MXU operands, f32 acc)
# --------------------------------------------------------------------------

def reference_forward(adj, x, params):
    wl1, wr1, b1, wl2, wr2, b2 = params
    mask_t = (adj != 0).astype(jnp.float32).T
    deg = jnp.sum(mask_t, axis=1, keepdims=True)
    inv_deg = jnp.where(deg > 0, 1.0 / jnp.maximum(deg, 1.0), 0.0)
    adj_bf = mask_t.astype(jnp.bfloat16)

    def layer(h_bf, wl, wr, b, relu):
        agg = (jnp.dot(adj_bf, h_bf, preferred_element_type=jnp.float32)
               * inv_deg).astype(jnp.bfloat16)
        out = (jnp.dot(agg, wl.astype(jnp.bfloat16),
                       preferred_element_type=jnp.float32)
               + jnp.dot(h_bf, wr.astype(jnp.bfloat16),
                         preferred_element_type=jnp.float32)
               + b)
        return jnp.maximum(out, 0.0) if relu else out

    h1 = layer(x.astype(jnp.bfloat16), wl1, wr1, b1, True).astype(jnp.bfloat16)
    return layer(h1, wl2, wr2, b2, False)


def init_params(key, feature_dim, hid_dim):
    """Deterministic synthetic parameter init (shapes from SAGEConv __init__)."""
    ks = jax.random.split(key, 6)

    def lin(k, fin, fout):
        scale = 1.0 / jnp.sqrt(jnp.float32(fin))
        return jax.random.uniform(k, (fin, fout), jnp.float32, -scale, scale)

    wl1 = lin(ks[0], feature_dim, hid_dim)      # conv1.lin_l.weight^T
    wr1 = lin(ks[1], feature_dim, hid_dim)      # conv1.lin_r.weight^T
    b1 = jax.random.uniform(ks[2], (1, hid_dim), jnp.float32, -0.1, 0.1)
    wl2 = lin(ks[3], hid_dim, feature_dim)      # conv2.lin_l.weight^T
    wr2 = lin(ks[4], hid_dim, feature_dim)      # conv2.lin_r.weight^T
    b2 = jax.random.uniform(ks[5], (1, feature_dim), jnp.float32, -0.1, 0.1)
    return (wl1, wr1, b1, wl2, wr2, b2)


if __name__ == "__main__":
    key = jax.random.PRNGKey(0)

    # ---- Config 1: module-sized graph -> fused single-kernel path ----------
    N1, feat1, hid1 = 16, 16, 32
    ka, kx, kp, key = jax.random.split(key, 4)
    adj1 = (jax.random.uniform(ka, (N1, N1)) < 0.3).astype(jnp.float32)
    x1 = jax.random.normal(kx, (N1, feat1), jnp.float32)
    params1 = init_params(kp, feat1, hid1)

    prep1 = prepare_graphsage(adj1, params1)
    out1 = jax.block_until_ready(graphsage_forward(prep1, x1))
    ref1 = reference_forward(adj1, x1, params1)
    assert out1.shape == (N1, feat1)
    assert jnp.allclose(out1, ref1, atol=2e-3, rtol=2e-3), float(
        jnp.max(jnp.abs(out1 - ref1)))

    # ---- Config 2: larger graph -> row x K tiled path (forced tm=128) ------
    N2, feat2, hid2 = 320, 64, 96
    ka, kx, kp, key = jax.random.split(key, 4)
    adj2 = (jax.random.uniform(ka, (N2, N2)) < 0.05).astype(jnp.float32)
    x2 = jax.random.normal(kx, (N2, feat2), jnp.float32)
    params2 = init_params(kp, feat2, hid2)

    prep2 = prepare_graphsage(adj2, params2, row_tile=128)
    assert not prep2.fused                     # exercises the tiled kernel
    out2 = jax.block_until_ready(graphsage_forward(prep2, x2))
    ref2 = reference_forward(adj2, x2, params2)
    assert out2.shape == (N2, feat2)
    assert jnp.allclose(out2, ref2, atol=2e-3, rtol=2e-3), float(
        jnp.max(jnp.abs(out2 - ref2)))

    print("KERNEL_OK")
</pallas_src>

<mosaic_0001>
module attributes {stable_mosaic.version = 11 : i64} {
  func.func @graphsage_fused_kernel(%arg0: i32, %arg1: memref<16x16xbf16, #tpu.memory_space<vmem>>, %arg2: memref<16x128xbf16, #tpu.memory_space<vmem>>, %arg3: memref<16x1xf32, #tpu.memory_space<vmem>>, %arg4: memref<128x128xbf16, #tpu.memory_space<vmem>>, %arg5: memref<128x128xbf16, #tpu.memory_space<vmem>>, %arg6: memref<1x128xf32, #tpu.memory_space<vmem>>, %arg7: memref<128x128xbf16, #tpu.memory_space<vmem>>, %arg8: memref<128x128xbf16, #tpu.memory_space<vmem>>, %arg9: memref<1x128xf32, #tpu.memory_space<vmem>>, %arg10: memref<16x128xf32, #tpu.memory_space<vmem>>) attributes {dimension_semantics = [#tpu.dimension_semantics<arbitrary>], iteration_bounds = array<i64: 1>, scalar_prefetch = 0 : i64, scratch_operands = 0 : i64, tpu.core_type = #tpu.core_type<tc>, window_params = [{pipeline_mode = #tpu.pipeline_mode<synchronous>, transform_indices = @transform_0, window_bounds = array<i64: 16, 16>}, {pipeline_mode = #tpu.pipeline_mode<synchronous>, transform_indices = @transform_1, window_bounds = array<i64: 16, 128>}, {pipeline_mode = #tpu.pipeline_mode<synchronous>, transform_indices = @transform_2, window_bounds = array<i64: 16, 1>}, {pipeline_mode = #tpu.pipeline_mode<synchronous>, transform_indices = @transform_3, window_bounds = array<i64: 128, 128>}, {pipeline_mode = #tpu.pipeline_mode<synchronous>, transform_indices = @transform_4, window_bounds = array<i64: 128, 128>}, {pipeline_mode = #tpu.pipeline_mode<synchronous>, transform_indices = @transform_5, window_bounds = array<i64: 1, 128>}, {pipeline_mode = #tpu.pipeline_mode<synchronous>, transform_indices = @transform_6, window_bounds = array<i64: 128, 128>}, {pipeline_mode = #tpu.pipeline_mode<synchronous>, transform_indices = @transform_7, window_bounds = array<i64: 128, 128>}, {pipeline_mode = #tpu.pipeline_mode<synchronous>, transform_indices = @transform_8, window_bounds = array<i64: 1, 128>}, {pipeline_mode = #tpu.pipeline_mode<synchronous>, transform_indices = @transform_9, window_bounds = array<i64: 16, 128>}]} {
    %c0 = arith.constant 0 : index
    %c0_0 = arith.constant 0 : index
    %0 = vector.load %arg1[%c0, %c0_0] : memref<16x16xbf16, #tpu.memory_space<vmem>>, vector<16x16xbf16>
    %c0_1 = arith.constant 0 : index
    %c0_2 = arith.constant 0 : index
    %1 = vector.load %arg2[%c0_1, %c0_2] : memref<16x128xbf16, #tpu.memory_space<vmem>>, vector<16x128xbf16>
    %c0_3 = arith.constant 0 : index
    %c0_4 = arith.constant 0 : index
    %2 = vector.load %arg3[%c0_3, %c0_4] : memref<16x1xf32, #tpu.memory_space<vmem>>, vector<16x1xf32>
    %cst = arith.constant dense<0.000000e+00> : vector<16x128xf32>
    %3 = tpu.matmul %0, %1, %cst {dimension_numbers = #tpu.dot_dimension_numbers<[1], [0], [0], [1], [0, 0, 1, 1], [], []>} : vector<16x16xbf16>, vector<16x128xbf16>, vector<16x128xf32> -> vector<16x128xf32>
    %4 = vector.broadcast %2 : vector<16x1xf32> to vector<16x128xf32>
    %5 = arith.mulf %3, %4 : vector<16x128xf32>
    %6 = arith.truncf %5 : vector<16x128xf32> to vector<16x128xbf16>
    %c0_5 = arith.constant 0 : index
    %c0_6 = arith.constant 0 : index
    %7 = vector.load %arg4[%c0_5, %c0_6] : memref<128x128xbf16, #tpu.memory_space<vmem>>, vector<128x128xbf16>
    %cst_7 = arith.constant dense<0.000000e+00> : vector<16x128xf32>
    %8 = tpu.matmul %6, %7, %cst_7 {dimension_numbers = #tpu.dot_dimension_numbers<[1], [0], [0], [1], [0, 0, 1, 1], [], []>} : vector<16x128xbf16>, vector<128x128xbf16>, vector<16x128xf32> -> vector<16x128xf32>
    %c0_8 = arith.constant 0 : index
    %c0_9 = arith.constant 0 : index
    %9 = vector.load %arg5[%c0_8, %c0_9] : memref<128x128xbf16, #tpu.memory_space<vmem>>, vector<128x128xbf16>
    %cst_10 = arith.constant dense<0.000000e+00> : vector<16x128xf32>
    %10 = tpu.matmul %1, %9, %cst_10 {dimension_numbers = #tpu.dot_dimension_numbers<[1], [0], [0], [1], [0, 0, 1, 1], [], []>} : vector<16x128xbf16>, vector<128x128xbf16>, vector<16x128xf32> -> vector<16x128xf32>
    %11 = arith.addf %8, %10 : vector<16x128xf32>
    %c0_11 = arith.constant 0 : index
    %c0_12 = arith.constant 0 : index
    %12 = vector.load %arg6[%c0_11, %c0_12] : memref<1x128xf32, #tpu.memory_space<vmem>>, vector<1x128xf32>
    %13 = vector.broadcast %12 : vector<1x128xf32> to vector<16x128xf32>
    %14 = arith.addf %11, %13 : vector<16x128xf32>
    %cst_13 = arith.constant 0.000000e+00 : f32
    %15 = vector.broadcast %cst_13 : f32 to vector<16x128xf32>
    %16 = arith.maximumf %14, %15 : vector<16x128xf32>
    %17 = arith.truncf %16 : vector<16x128xf32> to vector<16x128xbf16>
    %cst_14 = arith.constant dense<0.000000e+00> : vector<16x128xf32>
    %18 = tpu.matmul %0, %17, %cst_14 {dimension_numbers = #tpu.dot_dimension_numbers<[1], [0], [0], [1], [0, 0, 1, 1], [], []>} : vector<16x16xbf16>, vector<16x128xbf16>, vector<16x128xf32> -> vector<16x128xf32>
    %19 = vector.broadcast %2 : vector<16x1xf32> to vector<16x128xf32>
    %20 = arith.mulf %18, %19 : vector<16x128xf32>
    %21 = arith.truncf %20 : vector<16x128xf32> to vector<16x128xbf16>
    %c0_15 = arith.constant 0 : index
    %c0_16 = arith.constant 0 : index
    %22 = vector.load %arg7[%c0_15, %c0_16] : memref<128x128xbf16, #tpu.memory_space<vmem>>, vector<128x128xbf16>
    %cst_17 = arith.constant dense<0.000000e+00> : vector<16x128xf32>
    %23 = tpu.matmul %21, %22, %cst_17 {dimension_numbers = #tpu.dot_dimension_numbers<[1], [0], [0], [1], [0, 0, 1, 1], [], []>} : vector<16x128xbf16>, vector<128x128xbf16>, vector<16x128xf32> -> vector<16x128xf32>
    %c0_18 = arith.constant 0 : index
    %c0_19 = arith.constant 0 : index
    %24 = vector.load %arg8[%c0_18, %c0_19] : memref<128x128xbf16, #tpu.memory_space<vmem>>, vector<128x128xbf16>
    %cst_20 = arith.constant dense<0.000000e+00> : vector<16x128xf32>
    %25 = tpu.matmul %17, %24, %cst_20 {dimension_numbers = #tpu.dot_dimension_numbers<[1], [0], [0], [1], [0, 0, 1, 1], [], []>} : vector<16x128xbf16>, vector<128x128xbf16>, vector<16x128xf32> -> vector<16x128xf32>
    %26 = arith.addf %23, %25 : vector<16x128xf32>
    %c0_21 = arith.constant 0 : index
    %c0_22 = arith.constant 0 : index
    %27 = vector.load %arg9[%c0_21, %c0_22] : memref<1x128xf32, #tpu.memory_space<vmem>>, vector<1x128xf32>
    %28 = vector.broadcast %27 : vector<1x128xf32> to vector<16x128xf32>
    %29 = arith.addf %26, %28 : vector<16x128xf32>
    %c0_23 = arith.constant 0 : index
    %c0_24 = arith.constant 0 : index
    %30 = vector.load %arg10[%c0_23, %c0_24] : memref<16x128xf32, #tpu.memory_space<vmem>>, vector<16x128xf32>
    tpu.vector_store %arg10[%c0_23, %c0_24], %29 {strides = array<i32>} : memref<16x128xf32, #tpu.memory_space<vmem>>, vector<16x128xf32>,
    return
  }
  func.func @transform_0(%arg0: i32) -> (i32, i32) {
    %c0_i32 = arith.constant 0 : i32
    %c0_i32_0 = arith.constant 0 : i32
    %c0_i32_1 = arith.constant 0 : i32
    return %c0_i32, %c0_i32_0 : i32, i32
  }
  func.func @transform_1(%arg0: i32) -> (i32, i32) {
    %c0_i32 = arith.constant 0 : i32
    %c0_i32_0 = arith.constant 0 : i32
    %c0_i32_1 = arith.constant 0 : i32
    return %c0_i32, %c0_i32_0 : i32, i32
  }
  func.func @transform_2(%arg0: i32) -> (i32, i32) {
    %c0_i32 = arith.constant 0 : i32
    %c0_i32_0 = arith.constant 0 : i32
    %c0_i32_1 = arith.constant 0 : i32
    return %c0_i32, %c0_i32_0 : i32, i32
  }
  func.func @transform_3(%arg0: i32) -> (i32, i32) {
    %c0_i32 = arith.constant 0 : i32
    %c0_i32_0 = arith.constant 0 : i32
    %c0_i32_1 = arith.constant 0 : i32
    return %c0_i32, %c0_i32_0 : i32, i32
  }
  func.func @transform_4(%arg0: i32) -> (i32, i32) {
    %c0_i32 = arith.constant 0 : i32
    %c0_i32_0 = arith.constant 0 : i32
    %c0_i32_1 = arith.constant 0 : i32
    return %c0_i32, %c0_i32_0 : i32, i32
  }
  func.func @transform_5(%arg0: i32) -> (i32, i32) {
    %c0_i32 = arith.constant 0 : i32
    %c0_i32_0 = arith.constant 0 : i32
    %c0_i32_1 = arith.constant 0 : i32
    return %c0_i32, %c0_i32_0 : i32, i32
  }
  func.func @transform_6(%arg0: i32) -> (i32, i32) {
    %c0_i32 = arith.constant 0 : i32
    %c0_i32_0 = arith.constant 0 : i32
    %c0_i32_1 = arith.constant 0 : i32
    return %c0_i32, %c0_i32_0 : i32, i32
  }
  func.func @transform_7(%arg0: i32) -> (i32, i32) {
    %c0_i32 = arith.constant 0 : i32
    %c0_i32_0 = arith.constant 0 : i32
    %c0_i32_1 = arith.constant 0 : i32
    return %c0_i32, %c0_i32_0 : i32, i32
  }
  func.func @transform_8(%arg0: i32) -> (i32, i32) {
    %c0_i32 = arith.constant 0 : i32
    %c0_i32_0 = arith.constant 0 : i32
    %c0_i32_1 = arith.constant 0 : i32
    return %c0_i32, %c0_i32_0 : i32, i32
  }
  func.func @transform_9(%arg0: i32) -> (i32, i32) {
    %c0_i32 = arith.constant 0 : i32
    %c0_i32_0 = arith.constant 0 : i32
    %c0_i32_1 = arith.constant 0 : i32
    return %c0_i32, %c0_i32_0 : i32, i32
  }
}

</mosaic_0001>

<bundles_post_ra>
// kernel: tpu_custom_call.1
= control target key start
LH: loop header
LB: loop body
LE: loop exit
PB: predicated region body
PF: predicated region fallthrough
CT: control target
= control target key end

     0   :  { %14 = vsyncpa [#allocation3], 0  ;;  %s924_s0 = inlined_call_operand.vmem [shape: bf16[16,16], index: 0, kind: input, shape index: {}]   ;;  %s925_s1 = inlined_call_operand.vmem [shape: bf16[16,128], index: 1, kind: input, shape index: {}]   ;;  %s926_s2 = inlined_call_operand.vmem [shape: f32[16,1], index: 2, kind: input, shape index: {}]   ;;  %s927_s3 = inlined_call_operand.hbm [shape: bf16[128,128], index: 3, kind: input, shape index: {}]   ;;  %s928_s4 = inlined_call_operand.hbm [shape: bf16[128,128], index: 4, kind: input, shape index: {}]   ;;  %s929_s5 = inlined_call_operand.vmem [shape: f32[1,128], index: 5, kind: input, shape index: {}]   ;;  %s930_s6 = inlined_call_operand.hbm [shape: bf16[128,128], index: 6, kind: input, shape index: {}]   ;;  %s931_s7 = inlined_call_operand.hbm [shape: bf16[128,128], index: 7, kind: input, shape index: {}]   ;;  %s932_s8 = inlined_call_operand.vmem [shape: f32[1,128], index: 8, kind: input, shape index: {}]   ;;  %s933_s9 = inlined_call_operand.hbm [shape: f32[16,128], index: 9, kind: output, shape index: {}]  }
   0x1   :  { %15 = vsyncpa [#allocation6], 0 }
   0x2   :  { %16 = vsyncpa [#allocation9], 0 }
   0x3   :  { %17 = vsyncpa [#allocation4], 0  ;;  %s41_s11 = sshll.u32 %s928_s4, 4  ;;  %s825_s12 = smov [#allocation5]   ;;  %s42_s11 = int_to_ptr.hbm [resolvable:$true] %s41_s11 }
   0x4   :  { %s43_s13 = sshll.u32 %s825_s12, 4  ;;  %s28_s16 = sshll.u32 %s927_s3, 4  ;;  %s44_s13 = int_to_ptr.vmem [resolvable:$true] %s43_s13  ;;  %s29_s16 = int_to_ptr.hbm [resolvable:$true] %s28_s16 }
   0x5   :  { %s826_s17 = smov 64   ;;  %s827_s18 = smov 4  }
   0x6   :  { %49 = dma.hbm_to_vmem [thread:$0]  %s42_s11, 1024, %s44_s13, [#allocation6], %s826_s17, %s826_s17, %s827_s18  }
   0x7   :  { %s828_s19 = smov [#allocation2]   ;;  %s56_s23 = sshll.u32 %s930_s6, 4  ;;  %s57_s23 = int_to_ptr.hbm [resolvable:$true] %s56_s23 }
   0x8   :  { %s30_s20 = sshll.u32 %s828_s19, 4  ;;  %s69_s25 = sshll.u32 %s931_s7, 4  ;;  %s31_s20 = int_to_ptr.vmem [resolvable:$true] %s30_s20  ;;  %s70_s25 = int_to_ptr.hbm [resolvable:$true] %s69_s25 }
   0x9   :  { %36 = dma.hbm_to_vmem [thread:$0]  %s29_s16, 1024, %s31_s20, [#allocation3], %s826_s17, %s826_s17, %s827_s18  }
   0xa   :  { %s829_s26 = smov [#allocation7]   ;;  %s830_s3 = smov [#allocation8]  }
   0xb   :  { %s58_s27 = sshll.u32 %s829_s26, 4  ;;  %s71_s28 = sshll.u32 %s830_s3, 4  ;;  %s59_s27 = int_to_ptr.vmem [resolvable:$true] %s58_s27  ;;  %s72_s28 = int_to_ptr.vmem [resolvable:$true] %s71_s28 }
   0xc   :  { %64 = dma.hbm_to_vmem [thread:$0]  %s57_s23, 1024, %s59_s27, [#allocation6], %s826_s17, %s826_s17, %s827_s18  }
   0xd   :  { %77 = dma.hbm_to_vmem [thread:$0]  %s70_s25, 1024, %s72_s28, [#allocation9], %s826_s17, %s826_s17, %s827_s18  }
   0xe   :  { %817 = dma.done.wait [#allocation3], 1024  }
   0xf   :  { %818 = vsyncadd [#allocation3], 4294966272 }
  0x10   :  { %819 = dma.done.wait [#allocation6], 2048  }
  0x11   :  { %820 = vsyncadd [#allocation6], 4294965248 }
  0x12   :  { %821 = dma.done.wait [#allocation9], 1024  }
  0x13   :  { %822 = vsyncadd [#allocation9], 4294966272  ;;  %v831_v0 = vmov 0   ;;  %v651_v1 = vld [vmem:[%s925_s1] sm:$0xff]  ;;  %v667_v4 = vld [vmem:[#allocation5 + $0x38] sm:$0xff]  ;;  %vm114_vm0 = vcmask 130048  }
  0x14   :  { %694 = vset.pattern.permute.xlu0 %v831_v0  ;;  %v101_v2 = vld [vmem:[%s926_s2] sm:$0xff]  ;;  %v659_v5 = vld [vmem:[#allocation2 + $0x38] sm:$0xff]  ;;  %125 = vmatpush.bf16.msra.mxu0 %v651_v1  ;;  %v666_v6 = vld [vmem:[#allocation5 + $0x30] sm:$0xff]  ;;  %s832_s14 = smov [#allocation10]   ;;  %s497_s18 = sshll.u32 %s933_s9, 4  ;;  %s498_s18 = int_to_ptr.hbm [resolvable:$true] %s497_s18 }
  0x15   :  { %v906_v3 = vld [vmem:[%s924_s0] sm:$0xff]  ;;  %134 = vperm.xlu0 %694, %v101_v2   ;;  %225 = vmatpush.bf16.msra.mxu1 %v667_v4  ;;  %v658_v7 = vld [vmem:[#allocation2 + $0x30] sm:$0xff]  ;;  %v102_v8 = vld [vmem:[%s926_s2 + $0x8] sm:$0xff]  ;;  %s495_s15 = sshll.u32 %s832_s14, 4  ;;  %s833_s19 = smov 128   ;;  %s496_s15 = int_to_ptr.vmem [resolvable:$true] %s495_s15 }
  0x16   :  { %287 = vmatpush.bf16.msra.mxu2 %v659_v5  ;;  %v665_v9 = vld [vmem:[#allocation5 + $0x28] sm:$0xff]  ;;  %v664_v11 = vld [vmem:[#allocation5 + $0x20] sm:$0xff]  ;;  %v663_v13 = vld [vmem:[#allocation5 + $0x18] sm:$0xff]  ;;  %s834_s20 = smov 8  }
  0x17   :  { %520 = vmatmul.msk.bf16.vlgmr.msra.gmra.mxu0 %vm114_vm0, %v906_v3  ;;  %v657_v10 = vld [vmem:[#allocation2 + $0x28] sm:$0xff]  ;;  %v656_v12 = vld [vmem:[#allocation2 + $0x20] sm:$0xff]  ;;  %v655_v14 = vld [vmem:[#allocation2 + $0x18] sm:$0xff] }
  0x18   :  { %v662_v15 = vld [vmem:[#allocation5 + $0x10] sm:$0xff]  ;;  %v661_v17 = vld [vmem:[#allocation5 + $0x8] sm:$0xff]  ;;  %v660_v19 = vld [vmem:[#allocation5] sm:$0xff] }
  0x19   :  { %226 = vmatpush.bf16.msra.mxu1 %v666_v6  ;;  %v654_v16 = vld [vmem:[#allocation2 + $0x10] sm:$0xff]  ;;  %v653_v18 = vld [vmem:[#allocation2 + $0x8] sm:$0xff]  ;;  %v652_v20 = vld [vmem:[#allocation2] sm:$0xff] }
  0x1a   :  { %288 = vmatpush.bf16.msra.mxu2 %v658_v7  ;;  %v683_v21 = vld [vmem:[#allocation8 + $0x38] sm:$0xff]  ;;  %v682_v22 = vld [vmem:[#allocation8 + $0x30] sm:$0xff]  ;;  %v681_v30 = vld [vmem:[#allocation8 + $0x28] sm:$0xff] }
  0x1b   :  { %407 = vmatpush.bf16.msrb.mxu0 %v683_v21  ;;  %v680_v31 = vld [vmem:[#allocation8 + $0x20] sm:$0xff]  ;;  %v679_v32 = vld [vmem:[#allocation8 + $0x18] sm:$0xff]  ;;  %v678_v33 = vld [vmem:[#allocation8 + $0x10] sm:$0xff] }
  0x1c   :  { %v677_v34 = vld [vmem:[#allocation8 + $0x8] sm:$0xff]  ;;  %v676_v35 = vld [vmem:[#allocation8] sm:$0xff]  ;;  %v675_v47 = vld [vmem:[#allocation7 + $0x38] sm:$0xff] }
  0x1d   :  { %139 = vperm.xlu0 %694, %v102_v8   ;;  %227 = vmatpush.bf16.msra.mxu1 %v665_v9  ;;  %v695_v39 = vld [vmem:[%s929_s5] ss:$0 sm:$0xff]  ;;  %v674_v49 = vld [vmem:[#allocation7 + $0x30] sm:$0xff]  ;;  %v673_v50 = vld [vmem:[#allocation7 + $0x28] sm:$0xff] }
  0x1e   :  { %289 = vmatpush.bf16.msra.mxu2 %v657_v10  ;;  %v672_v51 = vld [vmem:[#allocation7 + $0x20] sm:$0xff]  ;;  %v671_v52 = vld [vmem:[#allocation7 + $0x18] sm:$0xff]  ;;  %v670_v53 = vld [vmem:[#allocation7 + $0x10] sm:$0xff] }
  0x1f   :  { %408 = vmatpush.bf16.msrb.mxu0 %v682_v22  ;;  %v669_v54 = vld [vmem:[#allocation7 + $0x8] sm:$0xff]  ;;  %v668_v55 = vld [vmem:[#allocation7] sm:$0xff] }
  0x20   :  { %v696_v62 = vld [vmem:[%s932_s8] ss:$0 sm:$0xff] }
  0x21   :  { %228 = vmatpush.bf16.msra.mxu1 %v664_v11 }
  0x22   :  { %290 = vmatpush.bf16.msra.mxu2 %v656_v12 }
  0x23   :  { %409 = vmatpush.bf16.msrb.mxu0 %v681_v30 }
  0x25   :  { %229 = vmatpush.bf16.msra.mxu1 %v663_v13 }
  0x26   :  { %291 = vmatpush.bf16.msra.mxu2 %v655_v14 }
  0x27   :  { %410 = vmatpush.bf16.msrb.mxu0 %v680_v31 }
  0x29   :  { %230 = vmatpush.bf16.msra.mxu1 %v662_v15 }
  0x2a   :  { %292 = vmatpush.bf16.msra.mxu2 %v654_v16 }
  0x2b   :  { %411 = vmatpush.bf16.msrb.mxu0 %v679_v32 }
  0x2d   :  { %231 = vmatpush.bf16.msra.mxu1 %v661_v17 }
  0x2e   :  { %293 = vmatpush.bf16.msra.mxu2 %v653_v18 }
  0x2f   :  { %412 = vmatpush.bf16.msrb.mxu0 %v678_v33 }
  0x31   :  { %232 = vmatpush.bf16.msra.mxu1 %v660_v19 }
  0x32   :  { %294 = vmatpush.bf16.msra.mxu2 %v652_v20 }
  0x33   :  { %413 = vmatpush.bf16.msrb.mxu0 %v677_v34 }
  0x34   :  { %233 = vmatmul.bf16.vlgmr.msra.gmra.mxu1 %v651_v1 }
  0x37   :  { %414 = vmatpush.bf16.msrb.mxu0 %v676_v35 }
  0x87   :  { %v135_v23 = vpop.permute.xlu0 %134 }
  0x8f   :  { %v140_v25 = vpop.permute.xlu0 %139 }
  0x94   :  { %v127_v24 = vpop.f32.mrf.mxu0 }
  0x95   :  { %v142_v27 = vmul.f32 %v135_v23, %v127_v24 }
  0x9c   :  { %v129_v26 = vpop.f32.mrf.mxu0 }
  0x9d   :  { %v143_v28 = vmul.f32 %v140_v25, %v129_v26 }
  0x9f   :  { %v144_v29 = vpack.c.bf16 %v143_v28, %v142_v27 }
  0xa1   :  { %295 = vmatmul.bf16.vlgmr.msra.gmra.mxu2 %v144_v29 }
  0xb1   :  { %v234_v36 = vpop.f32.mrf.mxu1 }
  0xb9   :  { %v236_v40 = vpop.f32.mrf.mxu1 }
 0x124   :  { %v296_v37 = vpop.f32.mrf.mxu2 }
 0x125   :  { %v297_v38 = vadd.f32 %v296_v37, %v234_v36 }
 0x127   :  { %v305_v42 = vadd.f32 %v695_v39, %v297_v38 }
 0x129   :  { %v307_v45 = vmax.f32 %v305_v42, 0.0 }
 0x12c   :  { %v298_v41 = vpop.f32.mrf.mxu2 }
 0x12d   :  { %v299_v43 = vadd.f32 %v298_v41, %v236_v40 }
 0x12f   :  { %v306_v44 = vadd.f32 %v695_v39, %v299_v43 }
 0x131   :  { %v308_v46 = vmax.f32 %v306_v44, 0.0 }
 0x133   :  { %v309_v48 = vpack.c.bf16 %v308_v46, %v307_v45 }
 0x135   :  { %317 = vmatpush.bf16.msra.mxu3 %v309_v48  ;;  %415 = vmatmul.bf16.vlgmr.msrb.gmra.mxu0 %v309_v48 }
 0x138   :  { %585 = vmatmul.msk.bf16.vlgmr.msra.gmra.mxu3 %vm114_vm0, %v906_v3 }
 0x139   :  { %469 = vmatpush.bf16.msrb.mxu3 %v675_v47 }
 0x13d   :  { %470 = vmatpush.bf16.msrb.mxu3 %v674_v49 }
 0x141   :  { %471 = vmatpush.bf16.msrb.mxu3 %v673_v50 }
 0x145   :  { %472 = vmatpush.bf16.msrb.mxu3 %v672_v51 }
 0x149   :  { %473 = vmatpush.bf16.msrb.mxu3 %v671_v52 }
 0x14d   :  { %474 = vmatpush.bf16.msrb.mxu3 %v670_v53 }
 0x151   :  { %475 = vmatpush.bf16.msrb.mxu3 %v669_v54 }
 0x155   :  { %476 = vmatpush.bf16.msrb.mxu3 %v668_v55 }
 0x1b2   :  { %v416_v61 = vpop.f32.mrf.mxu0 }
 0x1ba   :  { %v418_v2 = vpop.f32.mrf.mxu0 }
 0x1bb   :  { %v319_v56 = vpop.f32.mrf.mxu3 }
 0x1bc   :  { %v324_v58 = vmul.f32 %v319_v56, %v135_v23 }
 0x1c3   :  { %v321_v57 = vpop.f32.mrf.mxu3 }
 0x1c4   :  { %v325_v59 = vmul.f32 %v321_v57, %v140_v25 }
 0x1c6   :  { %v326_v60 = vpack.c.bf16 %v325_v59, %v324_v58 }
 0x1c8   :  { %477 = vmatmul.bf16.vlgmr.msrb.gmra.mxu3 %v326_v60 }
 0x24b   :  { %v478_v63 = vpop.f32.mrf.mxu3 }
 0x24c   :  { %v479_v0 = vadd.f32 %v478_v63, %v416_v61 }
 0x24e   :  { %v487_v1 = vadd.f32 %v696_v62, %v479_v0 }
 0x250   :  { %489 = vst [vmem:[#allocation10] sm:$0xff] %v487_v1 }
 0x253   :  { %v480_v3 = vpop.f32.mrf.mxu3 }
 0x254   :  { %v481_v4 = vadd.f32 %v480_v3, %v418_v2 }
 0x256   :  { %v488_v5 = vadd.f32 %v696_v62, %v481_v4 }
 0x258   :  { %490 = vst [vmem:[#allocation10 + $0x8] sm:$0xff] %v488_v5 }
 0x259   :  { %503 = dma.vmem_to_hbm [thread:$0]  %s496_s15, 256, %s498_s18, [#allocation4], %s833_s19, %s833_s19, %s834_s20  }
 0x25a   :  { %823 = dma.done.wait [#allocation4], 256  }
 0x25b   :  { %824 = vsyncadd [#allocation4], 4294967040 }
 0x25c   :  { %508 = vsyncpa [#allocation3], 1 }
 0x25d   :  { %509 = vsyncpa [#allocation6], 1 }
 0x25e   :  { %510 = vsyncpa [#allocation9], 1 }
 0x25f   :  { %511 = vsyncpa [#allocation4], 1 }

</bundles_post_ra>
